<compile_context>
chip_gen: v5e
topology: v5e:2x2
jax: 0.10.0
libtpu: 0.0.40
codegen_flags: <defaults>
</compile_context>

<pallas_src>
import functools
import math

import jax
import jax.numpy as jnp
from jax import lax
from jax.experimental import pallas as pl
from jax.experimental.pallas import tpu as pltpu

BN_EPS = 1e-5


def _round_up(x, m):
    return ((x + m - 1) // m) * m


def _vmem_capacity_bytes():
    """Physical per-core VMEM; conservative fallback if the query fails."""
    try:
        info = pltpu.get_tpu_info()
        cap = int(getattr(info, "vmem_capacity_bytes", 0))
        if cap > 0:
            return cap
    except Exception:
        pass
    return 64 * 1024 * 1024  # v7x physical per-TC VMEM (smallest of the three)


def _tile_candidates(dim_pad, max_tile):
    """Multiples of 128 that evenly divide dim_pad, largest first, capped."""
    max_tile = max(128, min(max_tile, dim_pad))
    cands = [t for t in range(128, dim_pad + 1, 128)
             if dim_pad % t == 0 and t <= max_tile]
    if not cands:
        cands = [dim_pad]
    return sorted(set(cands), reverse=True)


def _silu_bn_epilogue(y, pgb_ref, n_actual, use_act, out_dtype):
    """y: (n_pad, tile_f) f32 linear output with bias already added."""
    if use_act:
        # Exact SiLU: runs once per Fout panel, so the exact divide is free.
        y = y * (1.0 / (1.0 + jnp.exp(-y)))

    n_pad = y.shape[0]
    if n_pad != n_actual:
        # Keep padded batch rows out of the statistics; (n_pad, 1) mask only,
        # broadcasting handles lanes (no full-tile int32 iota materialized).
        row = lax.broadcasted_iota(jnp.int32, (n_pad, 1), 0)
        valid = row < n_actual
        y_stat = jnp.where(valid, y, 0.0)
    else:
        valid = None
        y_stat = y

    inv_n = 1.0 / n_actual
    mean = jnp.sum(y_stat, axis=0, keepdims=True) * inv_n
    centered = y_stat - mean
    if valid is not None:
        centered = jnp.where(valid, centered, 0.0)
    # Two-pass (centered) biased variance: numerically stabler than E[y^2]-m^2.
    var = jnp.sum(centered * centered, axis=0, keepdims=True) * inv_n

    pgb = pgb_ref[...]
    gamma = pgb[1:2, :].astype(jnp.float32)
    beta = pgb[2:3, :].astype(jnp.float32)
    scale = gamma * lax.rsqrt(var + BN_EPS)
    shift = beta - mean * scale
    return (y * scale + shift).astype(out_dtype)


def _hidden_block_resident_kernel(x_ref, w_ref, pgb_ref, o_ref, *,
                                  n_actual, use_act, mxu_dtype):
    """x resident in VMEM; one full-K MXU dot per Fout panel."""
    xa = x_ref[...]
    wa = w_ref[...]
    if mxu_dtype is not None:
        xa = xa.astype(mxu_dtype)  # bf16 MXU operands; f32 accumulation below
        wa = wa.astype(mxu_dtype)
    bias = pgb_ref[...][0:1, :].astype(jnp.float32)
    y = jnp.dot(xa, wa, preferred_element_type=jnp.float32) + bias
    o_ref[...] = _silu_bn_epilogue(y, pgb_ref, n_actual, use_act, o_ref.dtype)


def _hidden_block_ktiled_kernel(x_ref, w_ref, pgb_ref, o_ref, acc_ref, *,
                                n_actual, use_act, mxu_dtype):
    """(Fout, K) grid; f32 VMEM accumulator; epilogue on the last K step."""
    k = pl.program_id(1)

    @pl.when(k == 0)
    def _():
        # Fold the bias into the accumulator init (saves a full epilogue pass).
        bias = pgb_ref[...][0:1, :].astype(jnp.float32)
        acc_ref[...] = bias + jnp.zeros_like(acc_ref)

    xa = x_ref[...]
    wa = w_ref[...]
    if mxu_dtype is not None:
        xa = xa.astype(mxu_dtype)
        wa = wa.astype(mxu_dtype)
    acc_ref[...] += jnp.dot(xa, wa, preferred_element_type=jnp.float32)

    @pl.when(k == pl.num_programs(1) - 1)
    def _():
        o_ref[...] = _silu_bn_epilogue(acc_ref[...], pgb_ref,
                                       n_actual, use_act, o_ref.dtype)


def hidden_block(x, w_t, bias, gamma, beta, *, use_act=True, mxu_bf16=True,
                 force_ktiled=False):
    """Fused Linear -> SiLU -> BatchNorm1d (training-mode batch statistics).

    x:    (N, Fin)
    w_t:  (Fin, Fout)   -- PyTorch weight transposed ONCE at init, not per call.
    bias, gamma, beta: (Fout,)
    """
    n, fin = x.shape
    fin_w, fout = w_t.shape
    assert fin_w == fin, "weight must be pre-transposed to (Fin, Fout)"

    itemsize = jnp.dtype(x.dtype).itemsize
    sublane = max(8, 32 // itemsize)            # f32 -> 8, bf16 -> 16, i8 -> 32
    n_pad = _round_up(n, sublane)
    fin_pad = _round_up(fin, 128)
    fout_pad = _round_up(fout, 128)

    if (n_pad, fin_pad) != (n, fin):
        x = jnp.pad(x, ((0, n_pad - n), (0, fin_pad - fin)))
    if (fin_pad, fout_pad) != (fin, fout):
        w_t = jnp.pad(w_t, ((0, fin_pad - fin), (0, fout_pad - fout)))
    if fout_pad != fout:
        bias = jnp.pad(bias, (0, fout_pad - fout))
        gamma = jnp.pad(gamma, (0, fout_pad - fout))
        beta = jnp.pad(beta, (0, fout_pad - fout))

    # bias / gamma / beta ride in one stacked operand: one tiny DMA stream.
    pgb = jnp.stack([bias, gamma, beta], axis=0)          # (3, fout_pad)

    in_sz = jnp.dtype(x.dtype).itemsize
    w_sz = jnp.dtype(w_t.dtype).itemsize
    pgb_sz = jnp.dtype(pgb.dtype).itemsize
    out_sz = in_sz

    mxu_dtype = jnp.bfloat16 if (mxu_bf16 and x.dtype == jnp.float32) else None

    # VMEM budget: ~85% of physical capacity (headroom for compiler scratch /
    # semaphores), and tiles sized to ~90% of that (pipeline bookkeeping).
    vmem_limit = int(_vmem_capacity_bytes() * 0.85)
    tile_budget = int(vmem_limit * 0.90)

    # >= 2 Fout tiles whenever possible so v7x's two TensorCores both get work.
    max_fout_tile = fout_pad // 2 if fout_pad >= 256 else fout_pad
    fout_cands = _tile_candidates(fout_pad, min(max_fout_tile, 2048))

    def bytes_resident(tf):
        return (2 * n_pad * fin_pad * in_sz        # x (resident, dbl-buffered alloc)
                + 2 * fin_pad * tf * w_sz          # full-K weight panel
                + 2 * 3 * tf * pgb_sz
                + 2 * n_pad * tf * out_sz)

    def bytes_ktiled(tf, tk):
        return (2 * n_pad * tk * in_sz
                + 2 * tk * tf * w_sz
                + 2 * 3 * tf * pgb_sz
                + 2 * n_pad * tf * out_sz
                + n_pad * tf * 4)                  # f32 accumulator

    tile_fout_res = None
    if not force_ktiled:
        tile_fout_res = next(
            (tf for tf in fout_cands if bytes_resident(tf) <= tile_budget), None)

    if tile_fout_res is not None:
        # -------- Path A: x resident once, single full-K dot per Fout panel.
        tile_fout = tile_fout_res
        n_panels = fout_pad // tile_fout
        kernel = functools.partial(_hidden_block_resident_kernel,
                                   n_actual=n, use_act=use_act,
                                   mxu_dtype=mxu_dtype)
        grid_spec = pltpu.PrefetchScalarGridSpec(
            num_scalar_prefetch=0,
            grid=(n_panels,),
            in_specs=[
                pl.BlockSpec((n_pad, fin_pad), lambda j: (0, 0)),      # x (resident)
                pl.BlockSpec((fin_pad, tile_fout), lambda j: (0, j)),  # W^T panel
                pl.BlockSpec((3, tile_fout), lambda j: (0, j)),        # b/gamma/beta
            ],
            out_specs=pl.BlockSpec((n_pad, tile_fout), lambda j: (0, j)),
            scratch_shapes=[],
        )
        dim_sem = ("parallel",)
        bytes_accessed = (x.size * in_sz + w_t.size * w_sz
                          + pgb.size * pgb_sz + n_pad * fout_pad * out_sz)
    else:
        # -------- Path B: K-tiled streaming with an f32 accumulator.
        k_cands = _tile_candidates(fin_pad, 2048)
        chosen = None
        for tf in fout_cands:
            for tk in k_cands:
                if bytes_ktiled(tf, tk) <= tile_budget:
                    chosen = (tf, tk)
                    break
            if chosen is not None:
                break
        if chosen is None:
            # TODO(synk): N-tiled two-pass BatchNorm for batches too large for VMEM.
            raise ValueError(
                f"(N={n_pad}, Fout={fout_pad}) too large for VMEM budget "
                f"{tile_budget} bytes; an N grid axis is required.")
        tile_fout, tile_k = chosen
        n_panels = fout_pad // tile_fout
        kernel = functools.partial(_hidden_block_ktiled_kernel,
                                   n_actual=n, use_act=use_act,
                                   mxu_dtype=mxu_dtype)
        grid_spec = pltpu.PrefetchScalarGridSpec(
            num_scalar_prefetch=0,
            grid=(n_panels, fin_pad // tile_k),
            in_specs=[
                pl.BlockSpec((n_pad, tile_k), lambda j, k: (0, k)),       # x
                pl.BlockSpec((tile_k, tile_fout), lambda j, k: (k, j)),   # W^T
                pl.BlockSpec((3, tile_fout), lambda j, k: (0, j)),        # b/gamma/beta
            ],
            out_specs=pl.BlockSpec((n_pad, tile_fout), lambda j, k: (0, j)),
            scratch_shapes=[pltpu.VMEM((n_pad, tile_fout), jnp.float32)],
        )
        dim_sem = ("parallel", "arbitrary")
        bytes_accessed = (x.size * in_sz * n_panels     # x re-streamed per panel
                          + w_t.size * w_sz
                          + pgb.size * pgb_sz * n_panels
                          + n_pad * fout_pad * out_sz)

    cost = pl.CostEstimate(
        flops=2 * n_pad * fin_pad * fout_pad,
        transcendentals=(n_pad * fout_pad) if use_act else 0,
        bytes_accessed=int(bytes_accessed),
    )

    out = pl.pallas_call(
        kernel,
        out_shape=jax.ShapeDtypeStruct((n_pad, fout_pad), x.dtype),
        grid_spec=grid_spec,
        compiler_params=pltpu.CompilerParams(
            dimension_semantics=dim_sem,
            vmem_limit_bytes=vmem_limit,
        ),
        cost_estimate=cost,
    )(x, w_t, pgb)

    if (n_pad, fout_pad) != (n, fout):
        out = out[:n, :fout]
    return out


if __name__ == "__main__":
    # Small shapes implied by the module: x is (batch, in_features).
    batch, in_features, out_features = 8, 32, 64

    key = jax.random.PRNGKey(0)
    kx, kw, kb = jax.random.split(key, 3)

    x = jax.random.normal(kx, (batch, in_features), dtype=jnp.float32)

    # PyTorch-default-like init: Linear U(-1/sqrt(fan_in), ...), BN gamma=1, beta=0.
    bound = 1.0 / math.sqrt(in_features)
    weight = jax.random.uniform(kw, (out_features, in_features),
                                minval=-bound, maxval=bound, dtype=jnp.float32)
    bias = jax.random.uniform(kb, (out_features,),
                              minval=-bound, maxval=bound, dtype=jnp.float32)
    gamma = jnp.ones((out_features,), dtype=jnp.float32)
    beta = jnp.zeros((out_features,), dtype=jnp.float32)

    # Transpose the PyTorch-layout weight ONCE ("model init"), not per forward.
    w_t = jnp.transpose(weight)  # (Fin, Fout)

    def bn_silu_ref(y_lin):
        y = y_lin * (1.0 / (1.0 + jnp.exp(-y_lin)))
        m = jnp.mean(y, axis=0, keepdims=True)
        v = jnp.mean((y - m) ** 2, axis=0, keepdims=True)
        return (y - m) * lax.rsqrt(v + BN_EPS) * gamma + beta

    # Exercise both code paths (resident-x and K-tiled fallback).
    out_res = jax.block_until_ready(
        hidden_block(x, w_t, bias, gamma, beta, use_act=True))
    out_kt = jax.block_until_ready(
        hidden_block(x, w_t, bias, gamma, beta, use_act=True, force_ktiled=True))

    # Reference with the same bf16 MXU operand precision: isolates the kernel's
    # SiLU/BN/tiling correctness from the bf16 quantization of the matmul.
    y_lin_bf16 = jnp.dot(x.astype(jnp.bfloat16), w_t.astype(jnp.bfloat16),
                         preferred_element_type=jnp.float32) + bias
    ref_bf16 = bn_silu_ref(y_lin_bf16)

    # Full-f32 reference (PyTorch semantics); looser tolerance covers the bf16
    # MXU-operand quantization amplified by BN's 1/std.
    y_lin_f32 = x @ w_t + bias
    ref_f32 = bn_silu_ref(y_lin_f32)

    for name, out in (("resident", out_res), ("ktiled", out_kt)):
        assert out.shape == ref_f32.shape
        assert not bool(jnp.any(jnp.isnan(out))), f"NaNs in {name} output"
        err_tight = float(jnp.max(jnp.abs(out - ref_bf16)))
        assert jnp.allclose(out, ref_bf16, atol=2e-3, rtol=2e-3), (
            f"{name}: mismatch vs bf16-matmul reference (max abs err {err_tight})")
        err_f32 = float(jnp.max(jnp.abs(out - ref_f32)))
        assert jnp.allclose(out, ref_f32, atol=1e-1, rtol=1e-1), (
            f"{name}: mismatch vs f32 reference (max abs err {err_f32})")

    print("KERNEL_OK")
</pallas_src>

<mosaic_0001>
module attributes {stable_mosaic.version = 11 : i64} {
  func.func @_hidden_block_resident_kernel(%arg0: i32, %arg1: memref<8x128xf32, #tpu.memory_space<vmem>>, %arg2: memref<128x128xf32, #tpu.memory_space<vmem>>, %arg3: memref<3x128xf32, #tpu.memory_space<vmem>>, %arg4: memref<8x128xf32, #tpu.memory_space<vmem>>) attributes {dimension_semantics = [#tpu.dimension_semantics<parallel>], iteration_bounds = array<i64: 1>, scalar_prefetch = 0 : i64, scratch_operands = 0 : i64, tpu.core_type = #tpu.core_type<tc>, window_params = [{pipeline_mode = #tpu.pipeline_mode<synchronous>, transform_indices = @transform_0, window_bounds = array<i64: 8, 128>}, {transform_indices = @transform_1, window_bounds = array<i64: 128, 128>}, {transform_indices = @transform_2, window_bounds = array<i64: 3, 128>}, {transform_indices = @transform_3, window_bounds = array<i64: 8, 128>}]} {
    %c0 = arith.constant 0 : index
    %c0_0 = arith.constant 0 : index
    %0 = vector.load %arg1[%c0, %c0_0] : memref<8x128xf32, #tpu.memory_space<vmem>>, vector<8x128xf32>
    %c0_1 = arith.constant 0 : index
    %c0_2 = arith.constant 0 : index
    %1 = vector.load %arg2[%c0_1, %c0_2] : memref<128x128xf32, #tpu.memory_space<vmem>>, vector<128x128xf32>
    %2 = arith.truncf %0 : vector<8x128xf32> to vector<8x128xbf16>
    %3 = arith.truncf %1 : vector<128x128xf32> to vector<128x128xbf16>
    %c0_3 = arith.constant 0 : index
    %c0_4 = arith.constant 0 : index
    %4 = vector.load %arg3[%c0_3, %c0_4] : memref<3x128xf32, #tpu.memory_space<vmem>>, vector<3x128xf32>
    %5 = vector.extract_strided_slice %4 {offsets = [0, 0], sizes = [1, 128], strides = [1, 1]} : vector<3x128xf32> to vector<1x128xf32>
    %cst = arith.constant dense<0.000000e+00> : vector<8x128xf32>
    %6 = tpu.matmul %2, %3, %cst {dimension_numbers = #tpu.dot_dimension_numbers<[1], [0], [0], [1], [0, 0, 1, 1], [], []>} : vector<8x128xbf16>, vector<128x128xbf16>, vector<8x128xf32> -> vector<8x128xf32>
    %7 = vector.broadcast %5 : vector<1x128xf32> to vector<8x128xf32>
    %8 = arith.addf %6, %7 : vector<8x128xf32>
    %cst_5 = arith.constant 0.000000e+00 : f32
    %9 = vector.broadcast %cst_5 : f32 to vector<8x128xf32>
    %10 = arith.subf %9, %8 : vector<8x128xf32>
    %11 = math.exp %10 : vector<8x128xf32>
    %cst_6 = arith.constant 1.000000e+00 : f32
    %12 = vector.broadcast %cst_6 : f32 to vector<8x128xf32>
    %13 = arith.addf %12, %11 : vector<8x128xf32>
    %cst_7 = arith.constant 1.000000e+00 : f32
    %14 = vector.broadcast %cst_7 : f32 to vector<8x128xf32>
    %15 = arith.divf %14, %13 : vector<8x128xf32>
    %16 = arith.mulf %8, %15 : vector<8x128xf32>
    %cst_8 = arith.constant dense<0.000000e+00> : vector<128xf32>
    %17 = vector.multi_reduction <add>, %16, %cst_8 [0] : vector<8x128xf32> to vector<128xf32>
    %18 = vector.shape_cast %17 : vector<128xf32> to vector<1x128xf32>
    %cst_9 = arith.constant 1.250000e-01 : f32
    %19 = vector.broadcast %cst_9 : f32 to vector<1x128xf32>
    %20 = arith.mulf %18, %19 : vector<1x128xf32>
    %21 = vector.broadcast %20 : vector<1x128xf32> to vector<8x128xf32>
    %22 = arith.subf %16, %21 : vector<8x128xf32>
    %23 = arith.mulf %22, %22 : vector<8x128xf32>
    %cst_10 = arith.constant dense<0.000000e+00> : vector<128xf32>
    %24 = vector.multi_reduction <add>, %23, %cst_10 [0] : vector<8x128xf32> to vector<128xf32>
    %25 = vector.shape_cast %24 : vector<128xf32> to vector<1x128xf32>
    %cst_11 = arith.constant 1.250000e-01 : f32
    %26 = vector.broadcast %cst_11 : f32 to vector<1x128xf32>
    %27 = arith.mulf %25, %26 : vector<1x128xf32>
    %c0_12 = arith.constant 0 : index
    %c0_13 = arith.constant 0 : index
    %28 = vector.load %arg3[%c0_12, %c0_13] : memref<3x128xf32, #tpu.memory_space<vmem>>, vector<3x128xf32>
    %29 = vector.extract_strided_slice %28 {offsets = [1, 0], sizes = [1, 128], strides = [1, 1]} : vector<3x128xf32> to vector<1x128xf32>
    %30 = vector.extract_strided_slice %28 {offsets = [2, 0], sizes = [1, 128], strides = [1, 1]} : vector<3x128xf32> to vector<1x128xf32>
    %cst_14 = arith.constant 9.99999974E-6 : f32
    %31 = vector.broadcast %cst_14 : f32 to vector<1x128xf32>
    %32 = arith.addf %27, %31 : vector<1x128xf32>
    %33 = math.rsqrt %32 : vector<1x128xf32>
    %34 = arith.mulf %29, %33 : vector<1x128xf32>
    %35 = arith.mulf %20, %34 : vector<1x128xf32>
    %36 = arith.subf %30, %35 : vector<1x128xf32>
    %37 = vector.broadcast %34 : vector<1x128xf32> to vector<8x128xf32>
    %38 = arith.mulf %16, %37 : vector<8x128xf32>
    %39 = vector.broadcast %36 : vector<1x128xf32> to vector<8x128xf32>
    %40 = arith.addf %38, %39 : vector<8x128xf32>
    %c0_15 = arith.constant 0 : index
    %c0_16 = arith.constant 0 : index
    %41 = vector.load %arg4[%c0_15, %c0_16] : memref<8x128xf32, #tpu.memory_space<vmem>>, vector<8x128xf32>
    tpu.vector_store %arg4[%c0_15, %c0_16], %40 {strides = array<i32>} : memref<8x128xf32, #tpu.memory_space<vmem>>, vector<8x128xf32>,
    return
  }
  func.func @transform_0(%arg0: i32) -> (i32, i32) {
    %c0_i32 = arith.constant 0 : i32
    %c0_i32_0 = arith.constant 0 : i32
    %c0_i32_1 = arith.constant 0 : i32
    return %c0_i32, %c0_i32_0 : i32, i32
  }
  func.func @transform_1(%arg0: i32) -> (i32, i32) {
    %c0_i32 = arith.constant 0 : i32
    %c0_i32_0 = arith.constant 0 : i32
    return %c0_i32, %arg0 : i32, i32
  }
  func.func @transform_2(%arg0: i32) -> (i32, i32) {
    %c0_i32 = arith.constant 0 : i32
    %c0_i32_0 = arith.constant 0 : i32
    return %c0_i32, %arg0 : i32, i32
  }
  func.func @transform_3(%arg0: i32) -> (i32, i32) {
    %c0_i32 = arith.constant 0 : i32
    %c0_i32_0 = arith.constant 0 : i32
    return %c0_i32, %arg0 : i32, i32
  }
}

</mosaic_0001>

<bundles_post_ra>
// kernel: tpu_custom_call.1
= control target key start
LH: loop header
LB: loop body
LE: loop exit
PB: predicated region body
PF: predicated region fallthrough
CT: control target
= control target key end

     0   :  { %8 = vsyncpa [#allocation3], 0  ;;  %s327_s0 = inlined_call_operand.hbm [shape: f32[8,128], index: 0, kind: input, shape index: {}]   ;;  %s328_s1 = inlined_call_operand.hbm [shape: f32[128,128], index: 1, kind: input, shape index: {}]   ;;  %s329_s2 = inlined_call_operand.hbm [shape: f32[3,128], index: 2, kind: input, shape index: {}]   ;;  %s330_s3 = inlined_call_operand.hbm [shape: f32[8,128], index: 3, kind: output, shape index: {}]  }
   0x1   :  { %9 = vsyncpa [#allocation6], 0  ;;  %s26_s14 = sshll.u32 %s328_s1, 4  ;;  %s27_s14 = int_to_ptr.hbm [resolvable:$true] %s26_s14 }
   0x2   :  { %10 = vsyncpa [#allocation4], 0  ;;  %s289_s15 = smov [#allocation5]   ;;  %s16_s19 = sshll.u32 %s327_s0, 4  ;;  %s17_s19 = int_to_ptr.hbm [resolvable:$true] %s16_s19 }
   0x3   :  { %s28_s16 = sshll.u32 %s289_s15, 4  ;;  %s290_s20 = smov 128   ;;  %s29_s16 = int_to_ptr.vmem [resolvable:$true] %s28_s16 }
   0x4   :  { %s291_s21 = smov 8   ;;  %s292_s22 = smov [#allocation2]  }
   0x5   :  { %34 = dma.hbm_to_vmem [thread:$0]  %s27_s14, 2048, %s29_s16, [#allocation6], %s290_s20, %s290_s20, %s291_s21  }
   0x6   :  { %s18_s23 = sshll.u32 %s292_s22, 4  ;;  %s40_s26 = sshll.u32 %s329_s2, 4  ;;  %s19_s23 = int_to_ptr.vmem [resolvable:$true] %s18_s23  ;;  %s41_s26 = int_to_ptr.hbm [resolvable:$true] %s40_s26 }
   0x7   :  { %21 = dma.hbm_to_vmem [thread:$0]  %s17_s19, 128, %s19_s23, [#allocation3]  }
   0x8   :  { %s293_s1 = smov [#allocation7]  }
   0x9   :  { %s42_s27 = sshll.u32 %s293_s1, 4  ;;  %s43_s27 = int_to_ptr.vmem [resolvable:$true] %s42_s27 }
   0xa   :  { %45 = dma.hbm_to_vmem [thread:$0]  %s41_s26, 64, %s43_s27, [#allocation6]  }
   0xb   :  { %283 = dma.done.wait [#allocation3], 128  }
   0xc   :  { %284 = vsyncadd [#allocation3], 4294967168 }
   0xd   :  { %285 = dma.done.wait [#allocation6], 2112  }
   0xe   :  { %286 = vsyncadd [#allocation6], 4294965184  ;;  %v73_v0 = vld [vmem:[#allocation5 + $0x70] sm:$0xff]  ;;  %v74_v1 = vld [vmem:[#allocation5 + $0x78] sm:$0xff]  ;;  %s294_s0 = smov [#allocation8]   ;;  %s164_s30 = sshll.u32 %s330_s3, 4  ;;  %s165_s30 = int_to_ptr.hbm [resolvable:$true] %s164_s30 }
   0xf   :  { %v71_v2 = vld [vmem:[#allocation5 + $0x60] sm:$0xff]  ;;  %v83_v3 = vpack.c.bf16 %v74_v1, %v73_v0  ;;  %v72_v4 = vld [vmem:[#allocation5 + $0x68] sm:$0xff]  ;;  %v69_v6 = vld [vmem:[#allocation5 + $0x50] sm:$0xff]  ;;  %s162_s2 = sshll.u32 %s294_s0, 4  ;;  %s163_s2 = int_to_ptr.vmem [resolvable:$true] %s162_s2 }
  0x10   :  { %v82_v5 = vpack.c.bf16 %v72_v4, %v71_v2  ;;  %v70_v7 = vld [vmem:[#allocation5 + $0x58] sm:$0xff]  ;;  %v67_v9 = vld [vmem:[#allocation5 + $0x40] sm:$0xff]  ;;  %v68_v10 = vld [vmem:[#allocation5 + $0x48] sm:$0xff] }
  0x11   :  { %86 = vmatpush.bf16.msra.mxu0 %v83_v3  ;;  %v81_v8 = vpack.c.bf16 %v70_v7, %v69_v6  ;;  %v80_v11 = vpack.c.bf16 %v68_v10, %v67_v9  ;;  %v65_v12 = vld [vmem:[#allocation5 + $0x30] sm:$0xff]  ;;  %v66_v13 = vld [vmem:[#allocation5 + $0x38] sm:$0xff]  ;;  %v63_v15 = vld [vmem:[#allocation5 + $0x20] sm:$0xff] }
  0x12   :  { %v79_v14 = vpack.c.bf16 %v66_v13, %v65_v12  ;;  %v64_v16 = vld [vmem:[#allocation5 + $0x28] sm:$0xff]  ;;  %v61_v18 = vld [vmem:[#allocation5 + $0x10] sm:$0xff]  ;;  %v62_v19 = vld [vmem:[#allocation5 + $0x18] sm:$0xff] }
  0x13   :  { %v78_v17 = vpack.c.bf16 %v64_v16, %v63_v15  ;;  %v77_v20 = vpack.c.bf16 %v62_v19, %v61_v18  ;;  %v59_v21 = vld [vmem:[#allocation5] sm:$0xff]  ;;  %v60_v22 = vld [vmem:[#allocation5 + $0x8] sm:$0xff]  ;;  %v58_v24 = vld [vmem:[#allocation2] sm:$0xff] }
  0x14   :  { %v76_v23 = vpack.c.bf16 %v60_v22, %v59_v21  ;;  %v75_v25 = vpack.c.bf16 %v58_v24, %v58_v24  ;;  %v84_v26 = vld [vmem:[#allocation7] sm:$0x7] }
  0x15   :  { %87 = vmatpush.bf16.msra.mxu0 %v82_v5  ;;  %v85_v27 = vperm.slane %v84_v26, 0 }
  0x19   :  { %88 = vmatpush.bf16.msra.mxu0 %v81_v8 }
  0x1d   :  { %89 = vmatpush.bf16.msra.mxu0 %v80_v11 }
  0x21   :  { %90 = vmatpush.bf16.msra.mxu0 %v79_v14 }
  0x25   :  { %91 = vmatpush.bf16.msra.mxu0 %v78_v17 }
  0x29   :  { %92 = vmatpush.bf16.msra.mxu0 %v77_v20 }
  0x2d   :  { %93 = vmatpush.bf16.msra.mxu0 %v76_v23 }
  0x30   :  { %94 = vmatmul.bf16.vlgmr.msra.gmra.mxu0 %v75_v25 }
  0xad   :  { %v95_v28 = vpop.f32.mrf.mxu0 }
  0xae   :  { %v96_v29 = vadd.f32 %v95_v28, %v85_v27 }
  0xb0   :  { %v99_v30 = vsub.f32 0.0, %v96_v29 }
  0xb2   :  { %v100_v31 = vmul.f32 1.442695, %v99_v30 }
  0xb4   :  { %181 = vpow2.f32 %v100_v31 }
  0xb5   :  { %v97_v32 = vpop.f32.mrf.mxu0 }
  0xba   :  { %v182_v33 = vpop.eup %181 }
  0xbb   :  { %v102_v34 = vadd.f32 1.0, %v182_v33 }
  0xbd   :  { %183 = vrcp.f32 %v102_v34  ;;  %v114_v38 = vand.u32 2147483648, %v102_v34  ;;  %v112_v40 = vand.u32 2147483647, %v102_v34  ;;  %vm108_vm1 = vweird.f32 %v102_v34 }
  0xbf   :  { %v115_v42 = vor.u32 1.1754944e-38, %v114_v38  ;;  %vm113_vm3 = vcmp.eq.f32.partialorder %v112_v40, 8.507059e+37 }
  0xc3   :  { %v184_v35 = vpop.eup %183 }
  0xc4   :  { %v104_v36 = vmul.f32 %v184_v35, %v102_v34  ;;  %vm109_vm0 = vweird.f32 %v184_v35 }
  0xc5   :  { %vm110_vm2 = vmor %vm108_vm1, %vm109_vm0 }
  0xc6   :  { %v105_v37 = vsub.f32 1.0, %v104_v36 }
  0xc8   :  { %v106_v39 = vmul.f32 %v184_v35, %v105_v37 }
  0xca   :  { %v107_v41 = vadd.f32 %v184_v35, %v106_v39 }
  0xcc   :  { %v111_v43 = vsel %vm110_vm2, %v184_v35, %v107_v41 }
  0xcd   :  { %v116_v44 = vsel %vm113_vm3, %v115_v42, %v111_v43 }
  0xce   :  { %v118_v45 = vmul.f32 %v116_v44, %v96_v29 }
  0xd0   :  { %v119_v46 = vrot.slane %v118_v45, 4 }
  0xd2   :  { %v120_v47 = vadd.f32 %v119_v46, %v118_v45 }
  0xd4   :  { %v121_v48 = vrot.slane %v120_v47, 2 }
  0xd6   :  { %v122_v49 = vadd.f32 %v121_v48, %v120_v47 }
  0xd8   :  { %v123_v50 = vrot.slane %v122_v49, 1 }
  0xda   :  { %v124_v51 = vadd.f32 %v123_v50, %v122_v49 }
  0xdc   :  { %v125_v52 = vmul.f32 0.125, %v124_v51 }
  0xde   :  { %v126_v53 = vsub.f32 %v118_v45, %v125_v52 }
  0xe0   :  { %v127_v54 = vmul.f32 %v126_v53, %v126_v53 }
  0xe2   :  { %v128_v55 = vrot.slane %v127_v54, 4 }
  0xe4   :  { %v129_v56 = vadd.f32 %v128_v55, %v127_v54 }
  0xe6   :  { %v130_v57 = vrot.slane %v129_v56, 2 }
  0xe8   :  { %v131_v58 = vadd.f32 %v130_v57, %v129_v56 }
  0xea   :  { %v132_v59 = vrot.slane %v131_v58, 1 }
  0xec   :  { %v133_v60 = vadd.f32 %v132_v59, %v131_v58 }
  0xee   :  { %v134_v61 = vmul.f32 0.125, %v133_v60 }
  0xf0   :  { %v135_v62 = vadd.f32 1e-05, %v134_v61 }
  0xf2   :  { %185 = vrsqrt.f32 %v135_v62  ;;  %vm142_vm5 = vweird.f32 %v135_v62 }
  0xf8   :  { %v186_v63 = vpop.eup %185 }
  0xf9   :  { %v137_v0 = vmul.f32 %v186_v63, %v135_v62  ;;  %vm143_vm4 = vweird.f32 %v186_v63 }
  0xfa   :  { %vm144_vm6 = vmor %vm142_vm5, %vm143_vm4 }
  0xfb   :  { %v138_v1 = vmul.f32 %v186_v63, %v137_v0 }
  0xfd   :  { %v139_v2 = vmul.f32 0.5, %v138_v1 }
  0xff   :  { %v140_v3 = vsub.f32 1.5, %v139_v2 }
 0x101   :  { %v141_v4 = vmul.f32 %v186_v63, %v140_v3 }
 0x103   :  { %v145_v5 = vsel %vm144_vm6, %v186_v63, %v141_v4 }
 0x104   :  { %v146_v6 = vmul.f32 %v145_v5, %v84_v26 }
 0x106   :  { %v147_v7 = vmul.f32 %v146_v6, %v125_v52  ;;  %v152_v9 = vperm.slane %v146_v6, 1 }
 0x108   :  { %v149_v8 = vrot.slane %v147_v7, 7  ;;  %v153_v11 = vmul.f32 %v152_v9, %v118_v45 }
 0x10a   :  { %v151_v10 = vsub.f32 %v84_v26, %v149_v8 }
 0x10c   :  { %v154_v12 = vperm.slane %v151_v10, 2 }
 0x10e   :  { %v155_v13 = vadd.f32 %v154_v12, %v153_v11 }
 0x110   :  { %156 = vst [vmem:[#allocation8] sm:$0xff] %v155_v13 }
 0x111   :  { %167 = dma.vmem_to_hbm [thread:$0]  %s163_s2, 128, %s165_s30, [#allocation4]  }
 0x112   :  { %287 = dma.done.wait [#allocation4], 128  }
 0x113   :  { %288 = vsyncadd [#allocation4], 4294967168 }
 0x114   :  { %172 = vsyncpa [#allocation3], 1 }
 0x115   :  { %173 = vsyncpa [#allocation6], 1 }
 0x116   :  { %174 = vsyncpa [#allocation4], 1 }

</bundles_post_ra>
